<compile_context>
chip_gen: v7x
topology: tpu7x:2x2x1
jax: 0.10.0
libtpu: 0.0.40
codegen_flags: <defaults>
</compile_context>

<pallas_src>
import jax
import jax.numpy as jnp
from jax.experimental import pallas as pl
from jax.experimental.pallas import tpu as pltpu

_INV255 = 1.0 / 255.0
# Candidate lane widths (multiples of 128); pick the widest that divides n.
_LANE_CANDIDATES = (2048, 1024, 512, 256, 128)
# Per-buffer VMEM budget for the f32 output tile (~2 MiB keeps 2x(in+out)
# pipeline buffers comfortably under the scoped VMEM default on v5e/v6e/v7x).
_OUT_TILE_BYTES = 2 * 1024 * 1024


def _to_tensor_kernel(x_ref, o_ref):
    # One load + one multiply + one store per vreg; the cast is fused so uint8
    # inputs move only 1 byte/elem over HBM on the way in.
    o_ref[...] = x_ref[...].astype(jnp.float32) * jnp.float32(_INV255)


def to_tensor(x: jax.Array) -> jax.Array:
    """Pallas equivalent of ToTensor.forward: returns x / 255 as float32."""
    orig_shape = x.shape
    n = x.size

    # --- choose a lane-dense slab layout --------------------------------
    lane = None
    for cand in _LANE_CANDIDATES:
        if n % cand == 0:
            lane = cand
            break

    flat = x.reshape(-1)
    if lane is None:
        # Ragged total size: fall back to 128 lanes + zero padding.
        # TODO(synk): the pad/slice pair costs an extra HBM pass; only taken
        # when the element count is not divisible by 128.
        lane = 128
        rows = -(-n // lane)
        flat = jnp.pad(flat, (0, rows * lane - n))
    else:
        rows = n // lane
    slab = flat.reshape(rows, lane)

    # --- pick the row-tile size ------------------------------------------
    # Sublane granularity depends on input packing: 8 for 32-bit, 16 for
    # 16-bit, 32 for 8-bit dtypes.
    itemsize = jnp.dtype(x.dtype).itemsize
    sub = 8 * max(1, 4 // max(1, itemsize))
    max_tile_rows = max(sub, (_OUT_TILE_BYTES // (4 * lane)) // sub * sub)

    if rows <= max_tile_rows:
        # Whole slab fits in one comfortable block: a full-array block is
        # always a legal shape, even when rows is not a sublane multiple.
        tile_rows = rows
        grid = (1,)
    else:
        tile_rows = max_tile_rows
        grid = (pl.cdiv(rows, tile_rows),)

    out = pl.pallas_call(
        _to_tensor_kernel,
        out_shape=jax.ShapeDtypeStruct((rows, lane), jnp.float32),
        grid=grid,
        in_specs=[pl.BlockSpec((tile_rows, lane), lambda i: (i, 0))],
        out_specs=pl.BlockSpec((tile_rows, lane), lambda i: (i, 0)),
        compiler_params=pltpu.CompilerParams(
            dimension_semantics=("parallel",),
        ),
    )(slab)

    out_flat = out.reshape(-1)
    if out_flat.shape[0] != n:
        out_flat = out_flat[:n]
    return out_flat.reshape(orig_shape)


if __name__ == "__main__":
    key = jax.random.PRNGKey(0)
    k0, k1, k2, k3 = jax.random.split(key, 4)

    # 1) float32 NCHW batch (same small shape as before).
    x_f32 = jax.random.uniform(k0, (2, 4, 16, 16), dtype=jnp.float32,
                               minval=0.0, maxval=255.0)
    y = to_tensor(x_f32)
    jax.block_until_ready(y)
    assert y.shape == x_f32.shape and y.dtype == jnp.float32
    assert jnp.allclose(y, x_f32 / 255.0, atol=1e-6, rtol=1e-6)

    # 2) ragged element count (exercises the pad fallback path).
    x_odd = jax.random.uniform(k1, (2, 3, 15, 15), dtype=jnp.float32,
                               minval=0.0, maxval=255.0)
    y_odd = to_tensor(x_odd)
    jax.block_until_ready(y_odd)
    assert jnp.allclose(y_odd, x_odd / 255.0, atol=1e-6, rtol=1e-6)

    # 3) uint8 image bytes (ToTensor's usual input) -> cast fused in-kernel.
    x_u8 = jax.random.randint(k2, (4, 3, 32, 32), 0, 256,
                              dtype=jnp.int32).astype(jnp.uint8)
    y_u8 = to_tensor(x_u8)
    jax.block_until_ready(y_u8)
    assert y_u8.dtype == jnp.float32
    assert jnp.allclose(y_u8, x_u8.astype(jnp.float32) / 255.0,
                        atol=1e-6, rtol=1e-6)

    # 4) larger batch that exercises the tiled, pipelined (multi-step) grid.
    x_big = jax.random.uniform(k3, (16, 4, 128, 128), dtype=jnp.float32,
                               minval=0.0, maxval=255.0)
    y_big = to_tensor(x_big)
    jax.block_until_ready(y_big)
    assert jnp.allclose(y_big, x_big / 255.0, atol=1e-6, rtol=1e-6)

    print("KERNEL_OK")
</pallas_src>

<mosaic_0001>
module attributes {stable_mosaic.version = 11 : i64} {
  func.func @_to_tensor_kernel(%arg0: i32, %arg1: memref<1x2048xf32, #tpu.memory_space<vmem>>, %arg2: memref<1x2048xf32, #tpu.memory_space<vmem>>) attributes {dimension_semantics = [#tpu.dimension_semantics<parallel>], iteration_bounds = array<i64: 1>, scalar_prefetch = 0 : i64, scratch_operands = 0 : i64, tpu.core_type = #tpu.core_type<tc>, window_params = [{transform_indices = @transform_0, window_bounds = array<i64: 1, 2048>}, {transform_indices = @transform_1, window_bounds = array<i64: 1, 2048>}]} {
    %c0 = arith.constant 0 : index
    %c0_0 = arith.constant 0 : index
    %0 = vector.load %arg1[%c0, %c0_0] : memref<1x2048xf32, #tpu.memory_space<vmem>>, vector<1x2048xf32>
    %cst = arith.constant 0.00392156886 : f32
    %1 = vector.broadcast %cst : f32 to vector<1x2048xf32>
    %2 = arith.mulf %0, %1 : vector<1x2048xf32>
    %c0_1 = arith.constant 0 : index
    %c0_2 = arith.constant 0 : index
    %3 = vector.load %arg2[%c0_1, %c0_2] : memref<1x2048xf32, #tpu.memory_space<vmem>>, vector<1x2048xf32>
    tpu.vector_store %arg2[%c0_1, %c0_2], %2 {strides = array<i32>} : memref<1x2048xf32, #tpu.memory_space<vmem>>, vector<1x2048xf32>,
    return
  }
  func.func @transform_0(%arg0: i32) -> (i32, i32) {
    %c0_i32 = arith.constant 0 : i32
    %c0_i32_0 = arith.constant 0 : i32
    return %arg0, %c0_i32 : i32, i32
  }
  func.func @transform_1(%arg0: i32) -> (i32, i32) {
    %c0_i32 = arith.constant 0 : i32
    %c0_i32_0 = arith.constant 0 : i32
    return %arg0, %c0_i32 : i32, i32
  }
}

</mosaic_0001>

<bundles_post_ra>
// kernel: tpu_custom_call.1
= control target key start
LH: loop header
LB: loop body
LE: loop exit
PB: predicated region body
PF: predicated region fallthrough
CT: control target
= control target key end

     0   :  { %6 = vsyncpa [#allocation3], 0  ;;  %s128_s0 = inlined_call_operand.hbm [shape: f32[1,2048], index: 0, kind: input, shape index: {}]   ;;  %s129_s1 = inlined_call_operand.hbm [shape: f32[1,2048], index: 1, kind: output, shape index: {}]  }
   0x1   :  { %7 = vsyncpa [#allocation4], 0  ;;  %s92_s6 = smov [#allocation2]   ;;  %s44_s10 = scalar_lea.hbm %s128_s0, 256 }
   0x2   :  { %s14_s7 = sshll.u32 %s92_s6, 4  ;;  %p45_p0 = scmp.ne.s32.totalorder %s128_s0, %s44_s10  ;;  %s15_s7 = int_to_ptr.vmem [resolvable:$true] %s14_s7 }
   0x3   :  { %p48_p1 = scmp.lt.u32.totalorder %s44_s10, %s128_s0 }
   0x5   :  { %p50_p2 = pnand %p48_p1, %p45_p0 }
   0x7   :  { %53 = shalt.err (!%p50_p2)
}
   0x8   :  { %s54_s15 = scalar_lea.vmem %s15_s7, 256  ;;  %p59_p4 = scmp.lt.s32.totalorder %s15_s7, %s15_s7 }
   0x9   :  { %p55_p3 = scmp.ne.s32.totalorder %s15_s7, %s54_s15  ;;  %p60_p5 = scmp.lt.s32.totalorder %s54_s15, %s54_s15 }
   0xb   :  { %p61_p6 = por %p60_p5, %p59_p4 }
   0xd   :  { %p62_p7 = pnand %p61_p6, %p55_p3 }
   0xf   :  { %65 = shalt.err (!%p62_p7)
}
  0x10   :  { %17 = dma.hbm_to_vmem [thread:$0]  %s128_s0, 256, %s15_s7, [#allocation3]  }
  0x11   :  { %88 = dma.done.wait [#allocation3], 256  }
  0x12   :  { %89 = vsyncadd [#allocation3], 4294967040  ;;  %s93_s18 = smov [#allocation5]   ;;  %v21_v0 = vld [vmem:[#allocation2] sm:$0xff]  ;;  %v22_v1 = vld [vmem:[#allocation2 + $0x8] sm:$0xff] }
  0x13   :  { %s33_s19 = sshll.u32 %s93_s18, 4  ;;  %v23_v2 = vmul.f32 0.003921569, %v21_v0  ;;  %v24_v3 = vmul.f32 0.003921569, %v22_v1  ;;  %s34_s19 = int_to_ptr.vmem [resolvable:$true] %s33_s19 }
  0x14   :  { %s66_s20 = scalar_lea.vmem %s34_s19, 256  ;;  %p71_p9 = scmp.lt.s32.totalorder %s34_s19, %s34_s19 }
  0x15   :  { %25 = vst [vmem:[#allocation5] sm:$0xff] %v23_v2  ;;  %26 = vst [vmem:[#allocation5 + $0x8] sm:$0xff] %v24_v3  ;;  %p67_p8 = scmp.ne.s32.totalorder %s34_s19, %s66_s20  ;;  %p72_p10 = scmp.lt.s32.totalorder %s66_s20, %s66_s20 }
  0x17   :  { %p73_p11 = por %p72_p10, %p71_p9 }
  0x19   :  { %p74_p12 = pnand %p73_p11, %p67_p8 }
  0x1b   :  { %77 = shalt.err (!%p74_p12)
}
  0x1c   :  { %s78_s22 = scalar_lea.hbm %s129_s1, 256 }
  0x1d   :  { %p79_p13 = scmp.ne.s32.totalorder %s129_s1, %s78_s22  ;;  %p82_p0 = scmp.lt.u32.totalorder %s78_s22, %s129_s1 }
  0x1f   :  { %p84_p1 = pnand %p82_p0, %p79_p13 }
  0x21   :  { %87 = shalt.err (!%p84_p1)
}
  0x22   :  { %36 = dma.vmem_to_hbm [thread:$0]  %s34_s19, 256, %s129_s1, [#allocation4]  }
  0x23   :  { %90 = dma.done.wait [#allocation4], 256  }
  0x24   :  { %91 = vsyncadd [#allocation4], 4294967040 }
  0x25   :  { %40 = vsyncpa [#allocation3], 1 }
  0x26   :  { %41 = vsyncpa [#allocation4], 1 }

</bundles_post_ra>
